<compile_context>
chip_gen: v7x
topology: tpu7x:2x2x1
jax: 0.10.0
libtpu: 0.0.40
codegen_flags: <defaults>
</compile_context>

<pallas_src>
import functools

import jax
import jax.numpy as jnp
import numpy as np
from jax import lax
from jax.experimental import pallas as pl
from jax.experimental.pallas import tpu as pltpu


# ----------------------------------------------------------------------------
# static size planning
# ----------------------------------------------------------------------------
def _round_up(x, m):
    return ((x + m - 1) // m) * m


def _plan(H, W):
    """Static (Python int) size plan for the fused kernel.

    Layers 2-4 keep their activation flattened as (32, cols) with a constant
    row pitch equal to layer-1's output width.  A 3x3/stride-1 conv then only
    needs, per tap (kh, kw), the contiguous column slice starting at
    kh*pitch + kw.  Columns past each row's valid width hold wraparound
    garbage that is never read by any *valid* output position; stored column
    counts are padded so every tap slice stays in bounds.
    """
    ho1, wo1 = (H - 3) // 2 + 1, (W - 3) // 2 + 1
    hs = [ho1, ho1 - 2, ho1 - 4, ho1 - 6]
    ws = [wo1, wo1 - 2, wo1 - 4, wo1 - 6]
    assert hs[3] >= 1 and ws[3] >= 1, "input too small for 4 conv layers"
    pitch = wo1
    max_off = 2 * pitch + 2                      # largest tap offset (kh=kw=2)
    # s4 is also the HBM output block lane width: multiple of 128 so the final
    # store is one unmasked lane-dense store, and >= out_h*pitch so the wrapper
    # can compact (c, oh, ow) with a single slice+reshape.
    s4 = _round_up(hs[3] * pitch, 128)
    s3 = _round_up(s4 + max_off, 8)
    s2 = _round_up(s3 + max_off, 8)
    s1 = _round_up(max(s2 + max_off, ho1 * wo1), 8)
    return hs, ws, pitch, (s1, s2, s3, s4)


# ----------------------------------------------------------------------------
# fused Pallas kernel: whole encoder, B batch elements per grid step
# ----------------------------------------------------------------------------
def _encoder_fused_kernel(pt_ref, w1_ref, b1_ref, w2_ref, b2_ref,
                          w3_ref, b3_ref, w4_ref, b4_ref, o_ref, *,
                          pitch, s_rows, batch_block):
    s1, s2, s3, s4 = s_rows
    taps = [(kh, kw) for kh in range(3) for kw in range(3)]

    def conv3x3(a_prev, w_ref, b_ref, s_out):
        # Cast once per layer (hoisted out of the tap loop), then stack the
        # 9 tap slices along K so the whole layer is one K=288 bf16 matmul
        # with f32 accumulation inside the MXU.
        a_bf = a_prev.astype(jnp.bfloat16)
        stk = jnp.concatenate(
            [a_bf[:, kh * pitch + kw: kh * pitch + kw + s_out]
             for kh, kw in taps], axis=0)                       # (288, s_out)
        acc = jnp.dot(w_ref[...], stk, preferred_element_type=jnp.float32)
        return jnp.maximum(acc + b_ref[...], 0.0)               # (32, s_out)

    for bi in range(batch_block):
        # ---- layer 1: preprocess already folded into (W1/255, b1-0.5*sumW1),
        # patches arrive in bf16; bf16 MXU matmul with f32 accumulation. -----
        a = jnp.dot(w1_ref[...], pt_ref[bi],
                    preferred_element_type=jnp.float32)
        a = jnp.maximum(a + b1_ref[...], 0.0)                   # (32, s1) f32

        # ---- layers 2-4: 3x3 stride-1 convs, one stacked matmul each -------
        a = conv3x3(a, w2_ref, b2_ref, s2)
        a = conv3x3(a, w3_ref, b3_ref, s3)
        a = conv3x3(a, w4_ref, b4_ref, s4)                      # (32, s4) f32

        # single unmasked lane-dense store (s4 % 128 == 0)
        o_ref[bi] = a


# ----------------------------------------------------------------------------
# wrapper
# ----------------------------------------------------------------------------
def encoder_forward(obs_nchw, params):
    """obs_nchw: (N, C, H, W) float32 with values in [0, 255]."""
    N, C, H, W = obs_nchw.shape
    hs, ws, pitch, s_rows = _plan(H, W)
    s1, s2, s3, s4 = s_rows
    out_h, out_w = hs[3], ws[3]
    ho1, wo1 = hs[0], ws[0]
    cout = params[0][0].shape[-1]
    k1 = 9 * C

    # batch block size (amortize per-step overhead; keep grid >= 2 when we can)
    if N >= 8:
        B = 4
    elif N >= 4:
        B = 2
    else:
        B = 1
    Npad = _round_up(N, B)

    # --- XLA glue: layer-1 im2col (stride 2) on the raw obs, in bf16 --------
    # Tiny (~obs bytes at bf16, Cin is small); doing it here keeps all strided
    # access out of the kernel.  Layers 2-4 never touch HBM for activations.
    # The explicit zero pad keeps the wraparound-garbage columns finite.
    x = jnp.transpose(obs_nchw, (0, 2, 3, 1)).astype(jnp.bfloat16)   # NHWC
    cols = []
    for kh in range(3):
        for kw in range(3):
            cols.append(x[:, kh:kh + 2 * ho1:2, kw:kw + 2 * wo1:2, :])
    p = jnp.concatenate(cols, axis=-1).reshape(N, ho1 * wo1, k1)
    p = jnp.pad(p, ((0, Npad - N), (0, s1 - ho1 * wo1), (0, 0)))
    pt = jnp.transpose(p, (0, 2, 1))                       # (Npad, 9*Cin, S1)

    # --- layer-1 params with the /255 - 0.5 preprocess folded in (f32 math,
    # then bf16 weights) ------------------------------------------------------
    w1, b1 = params[0]
    w1f = jnp.asarray(w1, jnp.float32)                     # (3,3,Cin,32)
    b1c = (jnp.asarray(b1, jnp.float32)
           - 0.5 * jnp.sum(w1f, axis=(0, 1, 2))).reshape(cout, 1)
    w1t = (w1f * (1.0 / 255.0)).reshape(k1, cout).T.astype(jnp.bfloat16)

    # --- layers 2-4: tap-stacked weights (32, 9*32) bf16 ---------------------
    wst, bcs = [], []
    for (w, b) in params[1:]:
        cin = w.shape[2]
        wst.append(jnp.asarray(w, jnp.float32).reshape(9, cin, cout)
                   .transpose(2, 0, 1).reshape(cout, 9 * cin)
                   .astype(jnp.bfloat16))
        bcs.append(jnp.asarray(b, jnp.float32).reshape(cout, 1))

    kernel = functools.partial(_encoder_fused_kernel, pitch=pitch,
                               s_rows=s_rows, batch_block=B)

    wspec = pl.BlockSpec((cout, 9 * cout), lambda i: (0, 0))
    bspec = pl.BlockSpec((cout, 1), lambda i: (0, 0))

    out = pl.pallas_call(
        kernel,
        out_shape=jax.ShapeDtypeStruct((Npad, cout, s4), jnp.float32),
        grid_spec=pltpu.PrefetchScalarGridSpec(
            num_scalar_prefetch=0,
            grid=(Npad // B,),
            in_specs=[
                pl.BlockSpec((B, k1, s1), lambda i: (i, 0, 0)),  # patches (bf16)
                pl.BlockSpec((cout, k1), lambda i: (0, 0)),      # W1' (bf16)
                bspec,                                           # b1'
                wspec, bspec,                                    # layer 2
                wspec, bspec,                                    # layer 3
                wspec, bspec,                                    # layer 4
            ],
            out_specs=pl.BlockSpec((B, cout, s4), lambda i: (i, 0, 0)),
        ),
        compiler_params=pltpu.CompilerParams(
            dimension_semantics=("parallel",),
            # Per-step footprint is a few MB even for (9,84,84) with B=4 and
            # double buffering; 32 MiB leaves plenty of internal-scratch
            # headroom on every generation (incl. v7x's 64 MiB physical VMEM).
            vmem_limit_bytes=32 * 1024 * 1024),
    )(pt, w1t, b1c, wst[0], bcs[0], wst[1], bcs[1], wst[2], bcs[2])

    # --- one XLA slice+reshape: padded pitch layout -> PyTorch h.view(N,-1) --
    out = out[:N, :, :out_h * pitch].reshape(N, cout, out_h, pitch)[..., :out_w]
    return out.reshape(N, cout * out_h * out_w)


# ----------------------------------------------------------------------------
# parameter init + pure-JAX reference (for correctness check only)
# ----------------------------------------------------------------------------
def init_encoder_params(key, in_channels):
    """Deterministic synthetic init (shapes match the PyTorch module)."""
    # TODO(synk): the spec's weight_init helper is not defined in the module
    # snippet; synthetic gaussian init is used (forward math is unaffected).
    shapes = [
        (3, 3, in_channels, 32),   # Conv2d(obs_c, 32, 3, stride=2)
        (3, 3, 32, 32),            # Conv2d(32, 32, 3, stride=1)
        (3, 3, 32, 32),            # Conv2d(32, 32, 3, stride=1)
        (3, 3, 32, 32),            # Conv2d(32, 32, 3, stride=1)
    ]
    params = []
    for shp in shapes:
        key, kw = jax.random.split(key)
        w = jax.random.normal(kw, shp, dtype=jnp.float32) * 0.08
        b = jnp.zeros((shp[-1],), dtype=jnp.float32)
        params.append((w, b))
    return params


def encoder_forward_ref(obs_nchw, params):
    x = obs_nchw / 255.0 - 0.5
    strides = (2, 1, 1, 1)
    for i, (w, b) in enumerate(params):
        w_oihw = jnp.transpose(w, (3, 2, 0, 1))
        x = lax.conv_general_dilated(
            x, w_oihw, window_strides=(strides[i], strides[i]),
            padding="VALID", dimension_numbers=("NCHW", "OIHW", "NCHW"))
        x = jnp.maximum(x + b[None, :, None, None], 0.0)
    return x.reshape(x.shape[0], -1)


if __name__ == "__main__":
    key = jax.random.PRNGKey(0)
    k_obs, k_par = jax.random.split(key)

    # small shapes consistent with the module: obs_shape = (4, 24, 24)
    # (analog of the real (9, 84, 84) -> 32*35*35; here 24x24 -> 32*5*5)
    N, C, H, W = 2, 4, 24, 24
    obs = jax.random.uniform(k_obs, (N, C, H, W), dtype=jnp.float32) * 255.0
    params = init_encoder_params(k_par, C)

    fwd = jax.jit(encoder_forward)
    out = jax.block_until_ready(fwd(obs, params))
    ref = jax.block_until_ready(encoder_forward_ref(obs, params))

    assert out.shape == (N, 32 * 5 * 5), out.shape
    # NOTE for downstream consumers: all four conv layers run the MXU in bf16
    # (weights + activations/patches) with f32 accumulation -> relaxed tol.
    np.testing.assert_allclose(np.asarray(out), np.asarray(ref),
                               rtol=8e-2, atol=2e-2)
    print("KERNEL_OK")
</pallas_src>

<mosaic_0001>
module attributes {stable_mosaic.version = 11 : i64} {
  func.func @_encoder_fused_kernel(%arg0: i32, %arg1: memref<1x36x200xbf16, #tpu.memory_space<vmem>>, %arg2: memref<32x36xbf16, #tpu.memory_space<vmem>>, %arg3: memref<32x1xf32, #tpu.memory_space<vmem>>, %arg4: memref<32x288xbf16, #tpu.memory_space<vmem>>, %arg5: memref<32x1xf32, #tpu.memory_space<vmem>>, %arg6: memref<32x288xbf16, #tpu.memory_space<vmem>>, %arg7: memref<32x1xf32, #tpu.memory_space<vmem>>, %arg8: memref<32x288xbf16, #tpu.memory_space<vmem>>, %arg9: memref<32x1xf32, #tpu.memory_space<vmem>>, %arg10: memref<1x32x128xf32, #tpu.memory_space<vmem>>) attributes {dimension_semantics = [#tpu.dimension_semantics<parallel>], iteration_bounds = array<i64: 2>, scalar_prefetch = 0 : i64, scratch_operands = 0 : i64, tpu.core_type = #tpu.core_type<tc>, window_params = [{transform_indices = @transform_0, window_bounds = array<i64: 1, 36, 200>}, {pipeline_mode = #tpu.pipeline_mode<synchronous>, transform_indices = @transform_1, window_bounds = array<i64: 32, 36>}, {pipeline_mode = #tpu.pipeline_mode<synchronous>, transform_indices = @transform_2, window_bounds = array<i64: 32, 1>}, {pipeline_mode = #tpu.pipeline_mode<synchronous>, transform_indices = @transform_3, window_bounds = array<i64: 32, 288>}, {pipeline_mode = #tpu.pipeline_mode<synchronous>, transform_indices = @transform_4, window_bounds = array<i64: 32, 1>}, {pipeline_mode = #tpu.pipeline_mode<synchronous>, transform_indices = @transform_5, window_bounds = array<i64: 32, 288>}, {pipeline_mode = #tpu.pipeline_mode<synchronous>, transform_indices = @transform_6, window_bounds = array<i64: 32, 1>}, {pipeline_mode = #tpu.pipeline_mode<synchronous>, transform_indices = @transform_7, window_bounds = array<i64: 32, 288>}, {pipeline_mode = #tpu.pipeline_mode<synchronous>, transform_indices = @transform_8, window_bounds = array<i64: 32, 1>}, {transform_indices = @transform_9, window_bounds = array<i64: 1, 32, 128>}]} {
    %c0 = arith.constant 0 : index
    %c0_0 = arith.constant 0 : index
    %0 = vector.load %arg2[%c0, %c0_0] : memref<32x36xbf16, #tpu.memory_space<vmem>>, vector<32x36xbf16>
    %c0_1 = arith.constant 0 : index
    %c0_2 = arith.constant 0 : index
    %c0_3 = arith.constant 0 : index
    %1 = vector.load %arg1[%c0_1, %c0_2, %c0_3] : memref<1x36x200xbf16, #tpu.memory_space<vmem>>, vector<1x36x200xbf16>
    %2 = vector.shape_cast %1 : vector<1x36x200xbf16> to vector<36x200xbf16>
    %cst = arith.constant dense<0.000000e+00> : vector<32x200xf32>
    %3 = tpu.matmul %0, %2, %cst {dimension_numbers = #tpu.dot_dimension_numbers<[1], [0], [0], [1], [0, 0, 1, 1], [], []>} : vector<32x36xbf16>, vector<36x200xbf16>, vector<32x200xf32> -> vector<32x200xf32>
    %c0_4 = arith.constant 0 : index
    %c0_5 = arith.constant 0 : index
    %4 = vector.load %arg3[%c0_4, %c0_5] : memref<32x1xf32, #tpu.memory_space<vmem>>, vector<32x1xf32>
    %5 = vector.broadcast %4 : vector<32x1xf32> to vector<32x200xf32>
    %6 = arith.addf %3, %5 : vector<32x200xf32>
    %cst_6 = arith.constant 0.000000e+00 : f32
    %7 = vector.broadcast %cst_6 : f32 to vector<32x200xf32>
    %8 = arith.maximumf %6, %7 : vector<32x200xf32>
    %9 = arith.truncf %8 : vector<32x200xf32> to vector<32x200xbf16>
    %10 = vector.extract_strided_slice %9 {offsets = [0, 0], sizes = [32, 176], strides = [1, 1]} : vector<32x200xbf16> to vector<32x176xbf16>
    %11 = vector.extract_strided_slice %9 {offsets = [0, 1], sizes = [32, 176], strides = [1, 1]} : vector<32x200xbf16> to vector<32x176xbf16>
    %12 = vector.extract_strided_slice %9 {offsets = [0, 2], sizes = [32, 176], strides = [1, 1]} : vector<32x200xbf16> to vector<32x176xbf16>
    %13 = vector.extract_strided_slice %9 {offsets = [0, 11], sizes = [32, 176], strides = [1, 1]} : vector<32x200xbf16> to vector<32x176xbf16>
    %14 = vector.extract_strided_slice %9 {offsets = [0, 12], sizes = [32, 176], strides = [1, 1]} : vector<32x200xbf16> to vector<32x176xbf16>
    %15 = vector.extract_strided_slice %9 {offsets = [0, 13], sizes = [32, 176], strides = [1, 1]} : vector<32x200xbf16> to vector<32x176xbf16>
    %16 = vector.extract_strided_slice %9 {offsets = [0, 22], sizes = [32, 176], strides = [1, 1]} : vector<32x200xbf16> to vector<32x176xbf16>
    %17 = vector.extract_strided_slice %9 {offsets = [0, 23], sizes = [32, 176], strides = [1, 1]} : vector<32x200xbf16> to vector<32x176xbf16>
    %18 = vector.extract_strided_slice %9 {offsets = [0, 24], sizes = [32, 176], strides = [1, 1]} : vector<32x200xbf16> to vector<32x176xbf16>
    %19 = tpu.concatenate %10, %11, %12, %13, %14, %15, %16, %17, %18 in 0 : vector<32x176xbf16>, vector<32x176xbf16>, vector<32x176xbf16>, vector<32x176xbf16>, vector<32x176xbf16>, vector<32x176xbf16>, vector<32x176xbf16>, vector<32x176xbf16>, vector<32x176xbf16> -> vector<288x176xbf16>
    %c0_7 = arith.constant 0 : index
    %c0_8 = arith.constant 0 : index
    %20 = vector.load %arg4[%c0_7, %c0_8] : memref<32x288xbf16, #tpu.memory_space<vmem>>, vector<32x288xbf16>
    %cst_9 = arith.constant dense<0.000000e+00> : vector<32x176xf32>
    %21 = tpu.matmul %20, %19, %cst_9 {dimension_numbers = #tpu.dot_dimension_numbers<[1], [0], [0], [1], [0, 0, 1, 1], [], []>} : vector<32x288xbf16>, vector<288x176xbf16>, vector<32x176xf32> -> vector<32x176xf32>
    %c0_10 = arith.constant 0 : index
    %c0_11 = arith.constant 0 : index
    %22 = vector.load %arg5[%c0_10, %c0_11] : memref<32x1xf32, #tpu.memory_space<vmem>>, vector<32x1xf32>
    %23 = vector.broadcast %22 : vector<32x1xf32> to vector<32x176xf32>
    %24 = arith.addf %21, %23 : vector<32x176xf32>
    %cst_12 = arith.constant 0.000000e+00 : f32
    %25 = vector.broadcast %cst_12 : f32 to vector<32x176xf32>
    %26 = arith.maximumf %24, %25 : vector<32x176xf32>
    %27 = arith.truncf %26 : vector<32x176xf32> to vector<32x176xbf16>
    %28 = vector.extract_strided_slice %27 {offsets = [0, 0], sizes = [32, 152], strides = [1, 1]} : vector<32x176xbf16> to vector<32x152xbf16>
    %29 = vector.extract_strided_slice %27 {offsets = [0, 1], sizes = [32, 152], strides = [1, 1]} : vector<32x176xbf16> to vector<32x152xbf16>
    %30 = vector.extract_strided_slice %27 {offsets = [0, 2], sizes = [32, 152], strides = [1, 1]} : vector<32x176xbf16> to vector<32x152xbf16>
    %31 = vector.extract_strided_slice %27 {offsets = [0, 11], sizes = [32, 152], strides = [1, 1]} : vector<32x176xbf16> to vector<32x152xbf16>
    %32 = vector.extract_strided_slice %27 {offsets = [0, 12], sizes = [32, 152], strides = [1, 1]} : vector<32x176xbf16> to vector<32x152xbf16>
    %33 = vector.extract_strided_slice %27 {offsets = [0, 13], sizes = [32, 152], strides = [1, 1]} : vector<32x176xbf16> to vector<32x152xbf16>
    %34 = vector.extract_strided_slice %27 {offsets = [0, 22], sizes = [32, 152], strides = [1, 1]} : vector<32x176xbf16> to vector<32x152xbf16>
    %35 = vector.extract_strided_slice %27 {offsets = [0, 23], sizes = [32, 152], strides = [1, 1]} : vector<32x176xbf16> to vector<32x152xbf16>
    %36 = vector.extract_strided_slice %27 {offsets = [0, 24], sizes = [32, 152], strides = [1, 1]} : vector<32x176xbf16> to vector<32x152xbf16>
    %37 = tpu.concatenate %28, %29, %30, %31, %32, %33, %34, %35, %36 in 0 : vector<32x152xbf16>, vector<32x152xbf16>, vector<32x152xbf16>, vector<32x152xbf16>, vector<32x152xbf16>, vector<32x152xbf16>, vector<32x152xbf16>, vector<32x152xbf16>, vector<32x152xbf16> -> vector<288x152xbf16>
    %c0_13 = arith.constant 0 : index
    %c0_14 = arith.constant 0 : index
    %38 = vector.load %arg6[%c0_13, %c0_14] : memref<32x288xbf16, #tpu.memory_space<vmem>>, vector<32x288xbf16>
    %cst_15 = arith.constant dense<0.000000e+00> : vector<32x152xf32>
    %39 = tpu.matmul %38, %37, %cst_15 {dimension_numbers = #tpu.dot_dimension_numbers<[1], [0], [0], [1], [0, 0, 1, 1], [], []>} : vector<32x288xbf16>, vector<288x152xbf16>, vector<32x152xf32> -> vector<32x152xf32>
    %c0_16 = arith.constant 0 : index
    %c0_17 = arith.constant 0 : index
    %40 = vector.load %arg7[%c0_16, %c0_17] : memref<32x1xf32, #tpu.memory_space<vmem>>, vector<32x1xf32>
    %41 = vector.broadcast %40 : vector<32x1xf32> to vector<32x152xf32>
    %42 = arith.addf %39, %41 : vector<32x152xf32>
    %cst_18 = arith.constant 0.000000e+00 : f32
    %43 = vector.broadcast %cst_18 : f32 to vector<32x152xf32>
    %44 = arith.maximumf %42, %43 : vector<32x152xf32>
    %45 = arith.truncf %44 : vector<32x152xf32> to vector<32x152xbf16>
    %46 = vector.extract_strided_slice %45 {offsets = [0, 0], sizes = [32, 128], strides = [1, 1]} : vector<32x152xbf16> to vector<32x128xbf16>
    %47 = vector.extract_strided_slice %45 {offsets = [0, 1], sizes = [32, 128], strides = [1, 1]} : vector<32x152xbf16> to vector<32x128xbf16>
    %48 = vector.extract_strided_slice %45 {offsets = [0, 2], sizes = [32, 128], strides = [1, 1]} : vector<32x152xbf16> to vector<32x128xbf16>
    %49 = vector.extract_strided_slice %45 {offsets = [0, 11], sizes = [32, 128], strides = [1, 1]} : vector<32x152xbf16> to vector<32x128xbf16>
    %50 = vector.extract_strided_slice %45 {offsets = [0, 12], sizes = [32, 128], strides = [1, 1]} : vector<32x152xbf16> to vector<32x128xbf16>
    %51 = vector.extract_strided_slice %45 {offsets = [0, 13], sizes = [32, 128], strides = [1, 1]} : vector<32x152xbf16> to vector<32x128xbf16>
    %52 = vector.extract_strided_slice %45 {offsets = [0, 22], sizes = [32, 128], strides = [1, 1]} : vector<32x152xbf16> to vector<32x128xbf16>
    %53 = vector.extract_strided_slice %45 {offsets = [0, 23], sizes = [32, 128], strides = [1, 1]} : vector<32x152xbf16> to vector<32x128xbf16>
    %54 = vector.extract_strided_slice %45 {offsets = [0, 24], sizes = [32, 128], strides = [1, 1]} : vector<32x152xbf16> to vector<32x128xbf16>
    %55 = tpu.concatenate %46, %47, %48, %49, %50, %51, %52, %53, %54 in 0 : vector<32x128xbf16>, vector<32x128xbf16>, vector<32x128xbf16>, vector<32x128xbf16>, vector<32x128xbf16>, vector<32x128xbf16>, vector<32x128xbf16>, vector<32x128xbf16>, vector<32x128xbf16> -> vector<288x128xbf16>
    %c0_19 = arith.constant 0 : index
    %c0_20 = arith.constant 0 : index
    %56 = vector.load %arg8[%c0_19, %c0_20] : memref<32x288xbf16, #tpu.memory_space<vmem>>, vector<32x288xbf16>
    %cst_21 = arith.constant dense<0.000000e+00> : vector<32x128xf32>
    %57 = tpu.matmul %56, %55, %cst_21 {dimension_numbers = #tpu.dot_dimension_numbers<[1], [0], [0], [1], [0, 0, 1, 1], [], []>} : vector<32x288xbf16>, vector<288x128xbf16>, vector<32x128xf32> -> vector<32x128xf32>
    %c0_22 = arith.constant 0 : index
    %c0_23 = arith.constant 0 : index
    %58 = vector.load %arg9[%c0_22, %c0_23] : memref<32x1xf32, #tpu.memory_space<vmem>>, vector<32x1xf32>
    %59 = vector.broadcast %58 : vector<32x1xf32> to vector<32x128xf32>
    %60 = arith.addf %57, %59 : vector<32x128xf32>
    %cst_24 = arith.constant 0.000000e+00 : f32
    %61 = vector.broadcast %cst_24 : f32 to vector<32x128xf32>
    %62 = arith.maximumf %60, %61 : vector<32x128xf32>
    %c0_25 = arith.constant 0 : index
    %c0_26 = arith.constant 0 : index
    %c0_27 = arith.constant 0 : index
    %63 = vector.load %arg10[%c0_25, %c0_26, %c0_27] : memref<1x32x128xf32, #tpu.memory_space<vmem>>, vector<1x32x128xf32>
    %64 = vector.shape_cast %63 : vector<1x32x128xf32> to vector<32x128xf32>
    %65 = vector.shape_cast %62 : vector<32x128xf32> to vector<1x32x128xf32>
    tpu.vector_store %arg10[%c0_25, %c0_26, %c0_27], %65 {strides = array<i32>} : memref<1x32x128xf32, #tpu.memory_space<vmem>>, vector<1x32x128xf32>,
    return
  }
  func.func @transform_0(%arg0: i32) -> (i32, i32, i32) {
    %c0_i32 = arith.constant 0 : i32
    %c0_i32_0 = arith.constant 0 : i32
    %c0_i32_1 = arith.constant 0 : i32
    return %arg0, %c0_i32, %c0_i32_0 : i32, i32, i32
  }
  func.func @transform_1(%arg0: i32) -> (i32, i32) {
    %c0_i32 = arith.constant 0 : i32
    %c0_i32_0 = arith.constant 0 : i32
    %c0_i32_1 = arith.constant 0 : i32
    return %c0_i32, %c0_i32_0 : i32, i32
  }
  func.func @transform_2(%arg0: i32) -> (i32, i32) {
    %c0_i32 = arith.constant 0 : i32
    %c0_i32_0 = arith.constant 0 : i32
    %c0_i32_1 = arith.constant 0 : i32
    return %c0_i32, %c0_i32_0 : i32, i32
  }
  func.func @transform_3(%arg0: i32) -> (i32, i32) {
    %c0_i32 = arith.constant 0 : i32
    %c0_i32_0 = arith.constant 0 : i32
    %c0_i32_1 = arith.constant 0 : i32
    return %c0_i32, %c0_i32_0 : i32, i32
  }
  func.func @transform_4(%arg0: i32) -> (i32, i32) {
    %c0_i32 = arith.constant 0 : i32
    %c0_i32_0 = arith.constant 0 : i32
    %c0_i32_1 = arith.constant 0 : i32
    return %c0_i32, %c0_i32_0 : i32, i32
  }
  func.func @transform_5(%arg0: i32) -> (i32, i32) {
    %c0_i32 = arith.constant 0 : i32
    %c0_i32_0 = arith.constant 0 : i32
    %c0_i32_1 = arith.constant 0 : i32
    return %c0_i32, %c0_i32_0 : i32, i32
  }
  func.func @transform_6(%arg0: i32) -> (i32, i32) {
    %c0_i32 = arith.constant 0 : i32
    %c0_i32_0 = arith.constant 0 : i32
    %c0_i32_1 = arith.constant 0 : i32
    return %c0_i32, %c0_i32_0 : i32, i32
  }
  func.func @transform_7(%arg0: i32) -> (i32, i32) {
    %c0_i32 = arith.constant 0 : i32
    %c0_i32_0 = arith.constant 0 : i32
    %c0_i32_1 = arith.constant 0 : i32
    return %c0_i32, %c0_i32_0 : i32, i32
  }
  func.func @transform_8(%arg0: i32) -> (i32, i32) {
    %c0_i32 = arith.constant 0 : i32
    %c0_i32_0 = arith.constant 0 : i32
    %c0_i32_1 = arith.constant 0 : i32
    return %c0_i32, %c0_i32_0 : i32, i32
  }
  func.func @transform_9(%arg0: i32) -> (i32, i32, i32) {
    %c0_i32 = arith.constant 0 : i32
    %c0_i32_0 = arith.constant 0 : i32
    %c0_i32_1 = arith.constant 0 : i32
    return %arg0, %c0_i32, %c0_i32_0 : i32, i32, i32
  }
}

</mosaic_0001>

<bundles_post_ra>
// kernel: encoder_forward.1
= control target key start
LH: loop header
LB: loop body
LE: loop exit
PB: predicated region body
PF: predicated region fallthrough
CT: control target
= control target key end

     0   :  { %s1662_s30 = smov 0   ;;  %s1960_s0 = inlined_call_operand.vmem [shape: bf16[2,36,200], index: 0, kind: input, shape index: {}]   ;;  %s1961_s1 = inlined_call_operand.vmem [shape: bf16[32,36], index: 1, kind: input, shape index: {}]   ;;  %s1962_s2 = inlined_call_operand.vmem [shape: f32[32,1], index: 2, kind: input, shape index: {}]   ;;  %s1963_s3 = inlined_call_operand.vmem [shape: bf16[32,288], index: 3, kind: input, shape index: {}]   ;;  %s1964_s4 = inlined_call_operand.vmem [shape: f32[32,1], index: 4, kind: input, shape index: {}]   ;;  %s1965_s5 = inlined_call_operand.vmem [shape: bf16[32,288], index: 5, kind: input, shape index: {}]   ;;  %s1966_s6 = inlined_call_operand.vmem [shape: f32[32,1], index: 6, kind: input, shape index: {}]   ;;  %s1967_s7 = inlined_call_operand.vmem [shape: bf16[32,288], index: 7, kind: input, shape index: {}]   ;;  %s1968_s8 = inlined_call_operand.vmem [shape: f32[32,1], index: 8, kind: input, shape index: {}]   ;;  %s1969_s9 = inlined_call_operand.vmem [shape: f32[2,32,128], index: 9, kind: output, shape index: {}]  }
   0x1 LB: > { %s1423_s10 = sadd.s32 4294967295, %s1601_s30   ;;  %p1427_p0 = scmp.ge.s32.totalorder %s1601_s30, 1  ;;  %s1601_s30 = sphi %s1662_s30, %s19_s30  }
   0x2   : > { %p287_p1 = scmp.lt.s32.totalorder %s1601_s30, 3 }
   0x4   : > { %p288_p2 = pnand %p1427_p0, %p287_p1 }
   0x5   : > { %p323_p3 = scmp.lt.s32.totalorder (!%p288_p2), %s1423_s10, 1  ;;  %v1603_v0 = vmov (!%p288_p2), 0   ;;  %v343_v1 = vld [vmem:[%s1962_s2] sm:$0xff] (!%p288_p2)  ;;  %v344_v2 = vld [vmem:[%s1962_s2 + $0x8] sm:$0xff] (!%p288_p2)  ;;  %v345_v3 = vld [vmem:[%s1962_s2 + $0x10] sm:$0xff] (!%p288_p2)  ;;  %vm409_vm0 = vcmask (!%p288_p2), 1041408  }
   0x6   : > { %291 = sbr.rel (%p288_p2) target bundleno = 1478 (0x5c6), region = 56  ;;  %448 = vmatprep.mubr.bf16.mxu0 (!%p288_p2), %v1603_v0  ;;  %1559 = vset.pattern.permute.xlu0 (!%p288_p2), %v1603_v0  ;;  %v346_v4 = vld [vmem:[%s1962_s2 + $0x18] sm:$0xff] (!%p288_p2)  ;;  %v1569_v13 = vld [vmem:[%s1961_s1] sm:$0xff] (!%p288_p2)   ;;  %vm402_vm1 = vcmask (!%p288_p2), 293888   ;;  %v1570_v14 = vld [vmem:[%s1961_s1 + $0x8] sm:$0xff] (!%p288_p2)   ;;  %s1604_s27 = smov (!%p288_p2), 127  }
   0x7   : > { %1560 = vset.pattern.permute.xlu1 (!%p288_p2), %v1603_v0  ;;  %349 = vperm.xlu0 (!%p288_p2), %1559, %v343_v1   ;;  %s1605_s28 = smov (!%p288_p2), 126   ;;  %s1606_s29 = smov (!%p288_p2), 117   ;;  %v1573_v47 = vld [vmem:[%s1963_s3 + $0x4] ss:$12 sps:$4 sm:$0xff] (!%p288_p2)   ;;  %v614_v49 = vld [vmem:[%s1964_s4 + $0x8] sm:$0xff] (!%p288_p2)  ;;  %v616_v51 = vld [vmem:[%s1964_s4 + $0x18] sm:$0xff] (!%p288_p2) }
   0x8   : > { %359 = vperm.xlu1 (!%p288_p2), %1560, %v345_v3   ;;  %s1607_s11 = smov (!%p288_p2), 116   ;;  %s1608_s12 = smov (!%p288_p2), 115   ;;  %706 = vmatprep.mubr.bf16.mxu1 (!%p288_p2), %v1573_v47  ;;  %v613_v48 = vld [vmem:[%s1964_s4] sm:$0xff] (!%p288_p2)  ;;  %v615_v50 = vld [vmem:[%s1964_s4 + $0x10] sm:$0xff] (!%p288_p2)  ;;  %vm493_vm2 = vcmask (!%p288_p2), 1039360   ;;  %vm508_vm3 = vcmask (!%p288_p2), 1031168  }
   0x9   : > { %s1609_s13 = smov (!%p288_p2), 106   ;;  %s1610_s16 = smov (!%p288_p2), 105   ;;  %vm523_vm4 = vcmask (!%p288_p2), 957440   ;;  %vm538_vm5 = vcmask (!%p288_p2), 949248   ;;  %vm553_vm6 = vcmask (!%p288_p2), 941056   ;;  %vm568_vm7 = vcmask (!%p288_p2), 867328  }
   0xa   : > { %s1611_s17 = smov (!%p288_p2), 104   ;;  %vm583_vm8 = vcmask (!%p288_p2), 859136   ;;  %vm598_vm9 = vcmask (!%p288_p2), 850944   ;;  %vm667_vm10 = vcmask (!%p288_p2), 261120  }
   0xb   : > { %354 = vperm.xlu0 (!%p288_p2), %1559, %v344_v2  }
   0xc   : > { %364 = vperm.xlu1 (!%p288_p2), %1560, %v346_v4  }
   0xd   : > { %s1971_s10 = smov (!%p323_p3, %s1423_s10), 1 }
   0xe   : > { %s1541_s19 = smul.u32 40, %s1971_s10  ;;  %s1468_s24 = sshll.u32 %s1971_s10, 5 }
  0x10   : > { %s327_s22 = scalar_lea.vmem %s1960_s0, %s1541_s19 }
  0x11   : > { %v1561_v5 = vld [vmem:[%s327_s22 + $0x4] ss:$8 sps:$4 sm:$0xff]   ;;  %v1563_v6 = vld [vmem:[%s327_s22] ss:$8 sps:$4 sm:$0xff]   ;;  %v1564_v7 = vld [vmem:[%s327_s22 + $0x14] ss:$8 sps:$4 sm:$0xff]  }
  0x12   : > { %416 = vmatprep.subr.bf16.mxu0 %v1561_v5  ;;  %v1566_v8 = vld [vmem:[%s327_s22 + $0x10] ss:$8 sps:$4 sm:$0xff]   ;;  %v342_v9 = vld [vmem:[%s327_s22 + $0x20] sm:$0x33] }
  0x13   : > { %417 = vmatpush1.bf16.msra.mxu0 %v1563_v6  ;;  %v1438_v10 = vcombine.high %v342_v9, %v342_v9  ;;  %v1437_v11 = vcombine.low %v342_v9, %v342_v9 }
  0x14   : > { %418 = vmatprep.subr.bf16.mxu0 %v1564_v7 }
  0x15   : > { %v411_v12 = vsel %vm409_vm0, %v1437_v11, 0 }
  0x17   : > { %419 = vmatpush1.bf16.msra.mxu0 %v1566_v8 }
  0x18   : > { %1439 = vmatprep.subr.msk.bf16.mxu0 %vm409_vm0, %v1438_v10 }
  0x1b   : > { %421 = vmatpush1.bf16.msra.mxu0 %v411_v12 }
  0x1e   : > { %1440 = vmatmul.mubr.msk.bf16.vlgmr.msra.gmra.mrb[0].mxu0 %vm402_vm1, %v1569_v13 }
  0x1f   : > { %458 = vmatprep.mubr.bf16.mxu0 %v1603_v0 }
  0x26   : > { %1441 = vmatmul.mubr.msk.bf16.gmra.mrb[4].mxu0 %vm402_vm1, %v1570_v14 }
  0x86   : > { %v350_v15 = vpop.permute.xlu0 %349 }
  0x87   : > { %v360_v24 = vpop.permute.xlu1 %359 }
  0x8a   : > { %v355_v17 = vpop.permute.xlu0 %354 }
  0x8b   : > { %v365_v35 = vpop.permute.xlu1 %364 }
  0xf1   : > { %v450_v16 = vpop.f32.mrb[0].mxu0 }
  0xf2   : > { %v451_v18 = vadd.f32 %v450_v16, %v350_v15  ;;  %v452_v19 = vpop.f32.mrb[1].mxu0 }
  0xf3   : > { %v453_v20 = vadd.f32 %v452_v19, %v350_v15  ;;  %v454_v21 = vpop.f32.mrb[2].mxu0 }
  0xf4   : > { %v455_v22 = vadd.f32 %v454_v21, %v355_v17  ;;  %v456_v23 = vpop.f32.mrb[3].mxu0  ;;  %v469_v26 = vmax.f32 %v451_v18, 0.0 }
  0xf5   : > { %v457_v25 = vadd.f32 %v456_v23, %v355_v17  ;;  %v470_v28 = vmax.f32 %v453_v20, 0.0 }
  0xf6   : > { %v471_v27 = vmax.f32 %v455_v22, 0.0 }
  0xf7   : > { %v472_v29 = vmax.f32 %v457_v25, 0.0 }
  0xf8   : > { %v477_v30 = vpack.c.bf16 %v471_v27, %v469_v26 }
  0xf9   : > { %v478_v31 = vpack.c.bf16 %v472_v29, %v470_v28  ;;  %v460_v32 = vpop.f32.mrb[4].mxu0 }
  0xfa   : > { %v461_v33 = vadd.f32 %v460_v32, %v360_v24  ;;  %v462_v34 = vpop.f32.mrb[5].mxu0  ;;  %485 = vrot.lane.b32.xlu0 %v477_v30, %s1604_s27  ;;  %v1574_v32 = vld [vmem:[%s1963_s3 + $0x1c] ss:$12 sps:$4 sm:$0xff]  }
  0xfb   : > { %v463_v36 = vadd.f32 %v462_v34, %v360_v24  ;;  %v464_v37 = vpop.f32.mrb[6].mxu0  ;;  %487 = vrot.lane.b32.xlu1 %v478_v31, %s1604_s27  ;;  %674 = vmatprep.subr.bf16.mxu1 %v478_v31 }
  0xfc   : > { %v465_v38 = vadd.f32 %v464_v37, %v365_v35  ;;  %v466_v39 = vpop.f32.mrb[7].mxu0  ;;  %675 = vmatpush1.bf16.msra.mxu1 %v477_v30  ;;  %v473_v41 = vmax.f32 %v461_v33, 0.0 }
  0xfd   : > { %v467_v40 = vadd.f32 %v466_v39, %v365_v35  ;;  %v474_v43 = vmax.f32 %v463_v36, 0.0  ;;  %v1576_v39 = vld [vmem:[%s1963_s3 + $0x18] ss:$12 sps:$4 sm:$0xff]  }
  0xfe   : > { %v475_v42 = vmax.f32 %v465_v38, 0.0 }
  0xff   : > { %v476_v44 = vmax.f32 %v467_v40, 0.0  ;;  %v1577_v40 = vld [vmem:[%s1963_s3 + $0x8] ss:$12 sps:$4 sm:$0xff]  }
 0x100   : > { %v479_v45 = vpack.c.bf16 %v475_v42, %v473_v41  ;;  %v1578_v41 = vld [vmem:[%s1963_s3 + $0x20] ss:$12 sps:$4 sm:$0xff]  }
 0x101   : > { %v480_v46 = vpack.c.bf16 %v476_v44, %v474_v43 }
 0x102   : > { %489 = vrot.lane.b32.xlu0 %v479_v45, %s1604_s27 }
 0x103   : > { %491 = vrot.lane.b32.xlu1 %v480_v46, %s1604_s27  ;;  %676 = vmatprep.subr.bf16.mxu1 %v480_v46 }
 0x104   : > { %677 = vmatpush1.bf16.msra.mxu1 %v479_v45 }
 0x106   : > { %500 = vrot.lane.b32.xlu0 %v477_v30, %s1605_s28 }
 0x107   : > { %502 = vrot.lane.b32.xlu1 %v478_v31, %s1605_s28 }
 0x10a   : > { %504 = vrot.lane.b32.xlu0 %v479_v45, %s1605_s28 }
 0x10b   : > { %506 = vrot.lane.b32.xlu1 %v480_v46, %s1605_s28 }
 0x10e   : > { %515 = vrot.lane.b32.xlu0 %v477_v30, %s1606_s29 }
 0x10f   : > { %517 = vrot.lane.b32.xlu1 %v478_v31, %s1606_s29 }
 0x112   : > { %519 = vrot.lane.b32.xlu0 %v479_v45, %s1606_s29 }
 0x113   : > { %521 = vrot.lane.b32.xlu1 %v480_v46, %s1606_s29 }
 0x116   : > { %530 = vrot.lane.b32.xlu0 %v477_v30, %s1607_s11 }
 0x117   : > { %532 = vrot.lane.b32.xlu1 %v478_v31, %s1607_s11 }
 0x11a   : > { %534 = vrot.lane.b32.xlu0 %v479_v45, %s1607_s11 }
 0x11b   : > { %536 = vrot.lane.b32.xlu1 %v480_v46, %s1607_s11 }
 0x11e   : > { %545 = vrot.lane.b32.xlu0 %v477_v30, %s1608_s12 }
 0x11f   : > { %547 = vrot.lane.b32.xlu1 %v478_v31, %s1608_s12 }
 0x122   : > { %549 = vrot.lane.b32.xlu0 %v479_v45, %s1608_s12 }
 0x123   : > { %551 = vrot.lane.b32.xlu1 %v480_v46, %s1608_s12 }
 0x126   : > { %560 = vrot.lane.b32.xlu0 %v477_v30, %s1609_s13 }
 0x127   : > { %562 = vrot.lane.b32.xlu1 %v478_v31, %s1609_s13 }
 0x12a   : > { %564 = vrot.lane.b32.xlu0 %v479_v45, %s1609_s13 }
 0x12b   : > { %566 = vrot.lane.b32.xlu1 %v480_v46, %s1609_s13 }
 0x12e   : > { %575 = vrot.lane.b32.xlu0 %v477_v30, %s1610_s16 }
 0x12f   : > { %577 = vrot.lane.b32.xlu1 %v478_v31, %s1610_s16 }
 0x132   : > { %579 = vrot.lane.b32.xlu0 %v479_v45, %s1610_s16 }
 0x133   : > { %581 = vrot.lane.b32.xlu1 %v480_v46, %s1610_s16 }
 0x136   : > { %590 = vrot.lane.b32.xlu0 %v477_v30, %s1611_s17 }
 0x137   : > { %592 = vrot.lane.b32.xlu1 %v478_v31, %s1611_s17  ;;  %v1571_v31 = vld [vmem:[%s1963_s3] ss:$12 sps:$4 sm:$0xff]  }
 0x13a   : > { %594 = vrot.lane.b32.xlu0 %v479_v45, %s1611_s17 }
 0x13b   : > { %596 = vrot.lane.b32.xlu1 %v480_v46, %s1611_s17 }
 0x13e   : > { %619 = vperm.xlu0 %1559, %v613_v48  }
 0x13f   : > { %624 = vperm.xlu1 %1560, %v614_v49  }
 0x142   : > { %629 = vperm.xlu0 %1559, %v615_v50  }
 0x143   : > { %634 = vperm.xlu1 %1560, %v616_v51  }
 0x16c   : > { %v486_v52 = vpop.permute.xlu0 %485 }
 0x16d   : > { %v488_v53 = vpop.permute.xlu1 %487 }
 0x16e   : > { %678 = vmatprep.subr.bf16.mxu1 %v488_v53  ;;  %v494_v54 = vsel %vm493_vm2, %v486_v52, %v488_v53 }
 0x16f   : > { %679 = vmatpush1.bf16.msra.mxu1 %v494_v54 }
 0x174   : > { %v490_v55 = vpop.permute.xlu0 %489 }
 0x175   : > { %v492_v56 = vpop.permute.xlu1 %491 }
 0x176   : > { %680 = vmatprep.subr.bf16.mxu1 %v492_v56  ;;  %v495_v57 = vsel %vm493_vm2, %v490_v55, %v492_v56 }
 0x177   : > { %681 = vmatpush1.bf16.msra.mxu1 %v495_v57 }
 0x178   : > { %v501_v58 = vpop.permute.xlu0 %500 }
 0x179   : > { %v503_v59 = vpop.permute.xlu1 %502 }
 0x17a   : > { %682 = vmatprep.subr.bf16.mxu1 %v503_v59  ;;  %v509_v60 = vsel %vm508_vm3, %v501_v58, %v503_v59 }
 0x17b   : > { %683 = vmatpush1.bf16.msra.mxu1 %v509_v60 }
 0x17c   : > { %v505_v61 = vpop.permute.xlu0 %504 }
 0x17d   : > { %v507_v62 = vpop.permute.xlu1 %506 }
 0x17e   : > { %684 = vmatprep.subr.bf16.mxu1 %v507_v62  ;;  %v510_v63 = vsel %vm508_vm3, %v505_v61, %v507_v62 }
 0x17f   : > { %685 = vmatpush1.bf16.msra.mxu1 %v510_v63 }
 0x180   : > { %v516_v1 = vpop.permute.xlu0 %515 }
 0x181   : > { %v518_v2 = vpop.permute.xlu1 %517 }
 0x182   : > { %686 = vmatprep.subr.bf16.mxu1 %v518_v2  ;;  %v524_v3 = vsel %vm523_vm4, %v516_v1, %v518_v2 }
 0x183   : > { %687 = vmatpush1.bf16.msra.mxu1 %v524_v3 }
 0x184   : > { %v520_v4 = vpop.permute.xlu0 %519 }
 0x185   : > { %v522_v5 = vpop.permute.xlu1 %521 }
 0x186   : > { %688 = vmatprep.subr.bf16.mxu1 %v522_v5  ;;  %v525_v6 = vsel %vm523_vm4, %v520_v4, %v522_v5 }
 0x187   : > { %689 = vmatpush1.bf16.msra.mxu1 %v525_v6 }
 0x188   : > { %v531_v7 = vpop.permute.xlu0 %530 }
 0x189   : > { %v533_v8 = vpop.permute.xlu1 %532 }
 0x18a   : > { %690 = vmatprep.subr.bf16.mxu1 %v533_v8  ;;  %v539_v9 = vsel %vm538_vm5, %v531_v7, %v533_v8 }
 0x18b   : > { %691 = vmatpush1.bf16.msra.mxu1 %v539_v9 }
 0x18c   : > { %v535_v10 = vpop.permute.xlu0 %534 }
 0x18d   : > { %v537_v11 = vpop.permute.xlu1 %536 }
 0x18e   : > { %692 = vmatprep.subr.bf16.mxu1 %v537_v11  ;;  %v540_v12 = vsel %vm538_vm5, %v535_v10, %v537_v11  ;;  %v1581_v11 = vld [vmem:[%s1965_s5 + $0x4] ss:$12 sps:$4 sm:$0xff]  }
 0x18f   : > { %693 = vmatpush1.bf16.msra.mxu1 %v540_v12  ;;  %1008 = vmatprep.mubr.bf16.mxu0 %v1581_v11  ;;  %v916_v12 = vld [vmem:[%s1966_s6] sm:$0xff] }
 0x190   : > { %v546_v13 = vpop.permute.xlu0 %545 }
 0x191   : > { %v548_v14 = vpop.permute.xlu1 %547 }
 0x192   : > { %694 = vmatprep.subr.bf16.mxu1 %v548_v14  ;;  %v554_v15 = vsel %vm553_vm6, %v546_v13, %v548_v14  ;;  %v917_v13 = vld [vmem:[%s1966_s6 + $0x8] sm:$0xff]  ;;  %v918_v14 = vld [vmem:[%s1966_s6 + $0x10] sm:$0xff] }
 0x193   : > { %695 = vmatpush1.bf16.msra.mxu1 %v554_v15  ;;  %v919_v15 = vld [vmem:[%s1966_s6 + $0x18] sm:$0xff] }
 0x194   : > { %v550_v16 = vpop.permute.xlu0 %549 }
 0x195   : > { %v552_v17 = vpop.permute.xlu1 %551 }
 0x196   : > { %696 = vmatprep.subr.bf16.mxu1 %v552_v17  ;;  %v555_v18 = vsel %vm553_vm6, %v550_v16, %v552_v17 }
 0x197   : > { %697 = vmatpush1.bf16.msra.mxu1 %v555_v18 }
 0x198   : > { %v561_v19 = vpop.permute.xlu0 %560 }
 0x199   : > { %v563_v20 = vpop.permute.xlu1 %562 }
 0x19a   : > { %698 = vmatprep.subr.bf16.mxu1 %v563_v20  ;;  %v569_v21 = vsel %vm568_vm7, %v561_v19, %v563_v20 }
 0x19b   : > { %699 = vmatpush1.bf16.msra.mxu1 %v569_v21 }
 0x19c   : > { %v565_v22 = vpop.permute.xlu0 %564 }
 0x19d   : > { %v567_v23 = vpop.permute.xlu1 %566 }
 0x19e   : > { %700 = vmatprep.subr.bf16.mxu1 %v567_v23  ;;  %v570_v24 = vsel %vm568_vm7, %v565_v22, %v567_v23 }
 0x19f   : > { %701 = vmatpush1.bf16.msra.mxu1 %v570_v24 }
 0x1a0   : > { %v576_v25 = vpop.permute.xlu0 %575 }
 0x1a1   : > { %v578_v26 = vpop.permute.xlu1 %577 }
 0x1a2   : > { %702 = vmatprep.subr.bf16.mxu1 %v578_v26  ;;  %v584_v27 = vsel %vm583_vm8, %v576_v25, %v578_v26 }
 0x1a3   : > { %703 = vmatpush1.bf16.msra.mxu1 %v584_v27 }
 0x1a4   : > { %v580_v28 = vpop.permute.xlu0 %579 }
 0x1a5   : > { %v582_v29 = vpop.permute.xlu1 %581 }
 0x1a6   : > { %704 = vmatprep.subr.bf16.mxu1 %v582_v29  ;;  %v585_v30 = vsel %vm583_vm8, %v580_v28, %v582_v29 }
 0x1a7   : > { %705 = vmatpush1.bf16.msra.mxu1 %v585_v30 }
 0x1a8   : > { %v591_v33 = vpop.permute.xlu0 %590 }
 0x1a9   : > { %v593_v34 = vpop.permute.xlu1 %592 }
 0x1aa   : > { %v599_v35 = vsel %vm598_vm9, %v591_v33, %v593_v34  ;;  %707 = vmatmul.mubr.bf16.vlgmr.msra.gmra.mrb[0].mxu1 %v1571_v31  ;;  %727 = vmatprep.subr.bf16.mxu1 %v593_v34 }
 0x1ab   : > { %728 = vmatpush1.bf16.msra.mxu1 %v599_v35  ;;  %716 = vmatprep.mubr.bf16.mxu1 %v1574_v32 }
 0x1ac   : > { %v595_v36 = vpop.permute.xlu0 %594 }
 0x1ad   : > { %v597_v37 = vpop.permute.xlu1 %596 }
 0x1ae   : > { %v600_v38 = vsel %vm598_vm9, %v595_v36, %v597_v37  ;;  %729 = vmatprep.subr.bf16.mxu1 %v597_v37 }
 0x1af   : > { %730 = vmatpush1.bf16.msra.mxu1 %v600_v38 }
 0x1b2   : > { %717 = vmatmul.mubr.bf16.gmra.mrb[4].mxu1 %v1576_v39 }
 0x1b3   : > { %759 = vmatprep.mubr.bf16.mxu1 %v1603_v0 }
 0x1ba   : > { %1448 = vmatmul.mubr.msk.bf16.vlgmr.msra.gmra.mrb[0].mxu1 %vm667_vm10, %v1577_v40 }
 0x1bb   : > { %769 = vmatprep.mubr.bf16.mxu1 %v1603_v0 }
 0x1bd   : > { %v620_v42 = vpop.permute.xlu0 %619 }
 0x1be   : > { %v625_v46 = vpop.permute.xlu1 %624 }
 0x1c1   : > { %v630_v57 = vpop.permute.xlu0 %629 }
 0x1c2   : > { %1449 = vmatmul.mubr.msk.bf16.gmra.mrb[4].mxu1 %vm667_vm10, %v1578_v41  ;;  %v635_v62 = vpop.permute.xlu1 %634 }
 0x28d   : > { %v761_v43 = vpop.f32.mrb[0].mxu1 }
 0x28e   : > { %v1509_v44 = vadd.f32 %v761_v43, %v620_v42  ;;  %v763_v45 = vpop.f32.mrb[1].mxu1 }
 0x28f   : > { %v1510_v47 = vadd.f32 %v763_v45, %v620_v42  ;;  %v765_v48 = vpop.f32.mrb[2].mxu1 }
 0x290   : > { %v1511_v49 = vadd.f32 %v765_v48, %v625_v46  ;;  %v767_v50 = vpop.f32.mrb[3].mxu1  ;;  %v780_v52 = vmax.f32 %v1509_v44, 0.0 }
 0x291   : > { %v1512_v51 = vadd.f32 %v767_v50, %v625_v46  ;;  %v781_v54 = vmax.f32 %v1510_v47, 0.0 }
 0x292   : > { %v782_v53 = vmax.f32 %v1511_v49, 0.0 }
 0x293   : > { %v783_v55 = vmax.f32 %v1512_v51, 0.0 }
 0x294   : > { %v788_v56 = vpack.c.bf16 %v782_v53, %v780_v52 }
 0x295   : > { %v789_v58 = vpack.c.bf16 %v783_v55, %v781_v54  ;;  %v771_v59 = vpop.f32.mrb[4].mxu1 }
 0x296   : > { %v1513_v60 = vadd.f32 %v771_v59, %v630_v57  ;;  %v773_v61 = vpop.f32.mrb[5].mxu1  ;;  %796 = vrot.lane.b32.xlu0 %v788_v56, %s1604_s27  ;;  %v1582_v59 = vld [vmem:[%s1965_s5 + $0x1c] ss:$12 sps:$4 sm:$0xff]  }
 0x297   : > { %v1514_v63 = vadd.f32 %v773_v61, %v630_v57  ;;  %v775_v1 = vpop.f32.mrb[6].mxu1  ;;  %798 = vrot.lane.b32.xlu1 %v789_v58, %s1604_s27  ;;  %976 = vmatprep.subr.bf16.mxu0 %v789_v58 }
 0x298   : > { %v1515_v2 = vadd.f32 %v775_v1, %v635_v62  ;;  %v777_v3 = vpop.f32.mrb[7].mxu1  ;;  %977 = vmatpush1.bf16.msra.mxu0 %v788_v56  ;;  %v784_v5 = vmax.f32 %v1513_v60, 0.0 }
 0x299   : > { %v1516_v4 = vadd.f32 %v777_v3, %v635_v62  ;;  %v785_v7 = vmax.f32 %v1514_v63, 0.0  ;;  %v1584_v3 = vld [vmem:[%s1965_s5 + $0x18] ss:$12 sps:$4 sm:$0xff]  }
 0x29a   : > { %v786_v6 = vmax.f32 %v1515_v2, 0.0 }
 0x29b   : > { %v787_v8 = vmax.f32 %v1516_v4, 0.0  ;;  %v1585_v4 = vld [vmem:[%s1965_s5 + $0x8] ss:$12 sps:$4 sm:$0xff]  }
 0x29c   : > { %v790_v9 = vpack.c.bf16 %v786_v6, %v784_v5  ;;  %v1586_v5 = vld [vmem:[%s1965_s5 + $0x20] ss:$12 sps:$4 sm:$0xff]  }
 0x29d   : > { %v791_v10 = vpack.c.bf16 %v787_v8, %v785_v7 }
 0x29e   : > { %800 = vrot.lane.b32.xlu0 %v790_v9, %s1604_s27 }
 0x29f   : > { %802 = vrot.lane.b32.xlu1 %v791_v10, %s1604_s27  ;;  %978 = vmatprep.subr.bf16.mxu0 %v791_v10 }
 0x2a0   : > { %979 = vmatpush1.bf16.msra.mxu0 %v790_v9 }
 0x2a2   : > { %810 = vrot.lane.b32.xlu0 %v788_v56, %s1605_s28 }
 0x2a3   : > { %812 = vrot.lane.b32.xlu1 %v789_v58, %s1605_s28 }
 0x2a6   : > { %814 = vrot.lane.b32.xlu0 %v790_v9, %s1605_s28 }
 0x2a7   : > { %816 = vrot.lane.b32.xlu1 %v791_v10, %s1605_s28 }
 0x2aa   : > { %824 = vrot.lane.b32.xlu0 %v788_v56, %s1606_s29 }
 0x2ab   : > { %826 = vrot.lane.b32.xlu1 %v789_v58, %s1606_s29 }
 0x2ae   : > { %828 = vrot.lane.b32.xlu0 %v790_v9, %s1606_s29 }
 0x2af   : > { %830 = vrot.lane.b32.xlu1 %v791_v10, %s1606_s29 }
 0x2b2   : > { %838 = vrot.lane.b32.xlu0 %v788_v56, %s1607_s11 }
 0x2b3   : > { %840 = vrot.lane.b32.xlu1 %v789_v58, %s1607_s11 }
 0x2b6   : > { %842 = vrot.lane.b32.xlu0 %v790_v9, %s1607_s11 }
 0x2b7   : > { %844 = vrot.lane.b32.xlu1 %v791_v10, %s1607_s11 }
 0x2ba   : > { %852 = vrot.lane.b32.xlu0 %v788_v56, %s1608_s12 }
 0x2bb   : > { %854 = vrot.lane.b32.xlu1 %v789_v58, %s1608_s12 }
 0x2be   : > { %856 = vrot.lane.b32.xlu0 %v790_v9, %s1608_s12 }
 0x2bf   : > { %858 = vrot.lane.b32.xlu1 %v791_v10, %s1608_s12 }
 0x2c2   : > { %866 = vrot.lane.b32.xlu0 %v788_v56, %s1609_s13 }
 0x2c3   : > { %868 = vrot.lane.b32.xlu1 %v789_v58, %s1609_s13 }
 0x2c6   : > { %870 = vrot.lane.b32.xlu0 %v790_v9, %s1609_s13 }
 0x2c7   : > { %872 = vrot.lane.b32.xlu1 %v791_v10, %s1609_s13 }
 0x2ca   : > { %880 = vrot.lane.b32.xlu0 %v788_v56, %s1610_s16 }
 0x2cb   : > { %882 = vrot.lane.b32.xlu1 %v789_v58, %s1610_s16 }
 0x2ce   : > { %884 = vrot.lane.b32.xlu0 %v790_v9, %s1610_s16 }
 0x2cf   : > { %886 = vrot.lane.b32.xlu1 %v791_v10, %s1610_s16 }
 0x2d2   : > { %894 = vrot.lane.b32.xlu0 %v788_v56, %s1611_s17 }
 0x2d3   : > { %896 = vrot.lane.b32.xlu1 %v789_v58, %s1611_s17  ;;  %v1579_v58 = vld [vmem:[%s1965_s5] ss:$12 sps:$4 sm:$0xff]  }
 0x2d6   : > { %898 = vrot.lane.b32.xlu0 %v790_v9, %s1611_s17 }
 0x2d7   : > { %900 = vrot.lane.b32.xlu1 %v791_v10, %s1611_s17 }
 0x2da   : > { %922 = vperm.xlu0 %1559, %v916_v12  }
 0x2db   : > { %927 = vperm.xlu1 %1560, %v917_v13  }
 0x2de   : > { %932 = vperm.xlu0 %1559, %v918_v14  }
 0x2df   : > { %937 = vperm.xlu1 %1560, %v919_v15  }
 0x308   : > { %v797_v16 = vpop.permute.xlu0 %796 }
 0x309   : > { %v799_v17 = vpop.permute.xlu1 %798 }
 0x30a   : > { %v804_v18 = vsel %vm493_vm2, %v797_v16, %v799_v17  ;;  %980 = vmatprep.subr.bf16.mxu0 %v799_v17 }
 0x30b   : > { %981 = vmatpush1.bf16.msra.mxu0 %v804_v18 }
 0x310   : > { %v801_v19 = vpop.permute.xlu0 %800 }
 0x311   : > { %v803_v20 = vpop.permute.xlu1 %802 }
 0x312   : > { %v805_v21 = vsel %vm493_vm2, %v801_v19, %v803_v20  ;;  %982 = vmatprep.subr.bf16.mxu0 %v803_v20 }
 0x313   : > { %983 = vmatpush1.bf16.msra.mxu0 %v805_v21 }
 0x314   : > { %v811_v22 = vpop.permute.xlu0 %810 }
 0x315   : > { %v813_v23 = vpop.permute.xlu1 %812 }
 0x316   : > { %v818_v24 = vsel %vm508_vm3, %v811_v22, %v813_v23  ;;  %984 = vmatprep.subr.bf16.mxu0 %v813_v23 }
 0x317   : > { %985 = vmatpush1.bf16.msra.mxu0 %v818_v24 }
 0x318   : > { %v815_v25 = vpop.permute.xlu0 %814 }
 0x319   : > { %v817_v26 = vpop.permute.xlu1 %816 }
 0x31a   : > { %v819_v27 = vsel %vm508_vm3, %v815_v25, %v817_v26  ;;  %986 = vmatprep.subr.bf16.mxu0 %v817_v26 }
 0x31b   : > { %987 = vmatpush1.bf16.msra.mxu0 %v819_v27 }
 0x31c   : > { %v825_v28 = vpop.permute.xlu0 %824 }
 0x31d   : > { %v827_v29 = vpop.permute.xlu1 %826 }
 0x31e   : > { %v832_v30 = vsel %vm523_vm4, %v825_v28, %v827_v29  ;;  %988 = vmatprep.subr.bf16.mxu0 %v827_v29 }
 0x31f   : > { %989 = vmatpush1.bf16.msra.mxu0 %v832_v30 }
 0x320   : > { %v829_v31 = vpop.permute.xlu0 %828 }
 0x321   : > { %v831_v32 = vpop.permute.xlu1 %830 }
 0x322   : > { %v833_v33 = vsel %vm523_vm4, %v829_v31, %v831_v32  ;;  %990 = vmatprep.subr.bf16.mxu0 %v831_v32 }
 0x323   : > { %991 = vmatpush1.bf16.msra.mxu0 %v833_v33 }
 0x324   : > { %v839_v34 = vpop.permute.xlu0 %838 }
 0x325   : > { %v841_v35 = vpop.permute.xlu1 %840 }
 0x326   : > { %v846_v36 = vsel %vm538_vm5, %v839_v34, %v841_v35  ;;  %992 = vmatprep.subr.bf16.mxu0 %v841_v35 }
 0x327   : > { %993 = vmatpush1.bf16.msra.mxu0 %v846_v36 }
 0x328   : > { %v843_v37 = vpop.permute.xlu0 %842 }
 0x329   : > { %v845_v38 = vpop.permute.xlu1 %844 }
 0x32a   : > { %v847_v39 = vsel %vm538_vm5, %v843_v37, %v845_v38  ;;  %994 = vmatprep.subr.bf16.mxu0 %v845_v38  ;;  %v1589_v37 = vld [vmem:[%s1967_s7 + $0x4] ss:$12 sps:$4 sm:$0xff]   ;;  %v1593_v38 = vld [vmem:[%s1967_s7 + $0x8] ss:$12 sps:$4 sm:$0xff]  }
 0x32b   : > { %995 = vmatpush1.bf16.msra.mxu0 %v847_v39  ;;  %1294 = vmatprep.mubr.bf16.mxu1 %v1589_v37  ;;  %v1202_v39 = vld [vmem:[%s1968_s8] sm:$0xff] }
 0x32c   : > { %v853_v40 = vpop.permute.xlu0 %852 }
 0x32d   : > { %v855_v41 = vpop.permute.xlu1 %854 }
 0x32e   : > { %v860_v42 = vsel %vm553_vm6, %v853_v40, %v855_v41  ;;  %996 = vmatprep.subr.bf16.mxu0 %v855_v41  ;;  %v1203_v40 = vld [vmem:[%s1968_s8 + $0x8] sm:$0xff]  ;;  %v1204_v41 = vld [vmem:[%s1968_s8 + $0x10] sm:$0xff] }
 0x32f   : > { %997 = vmatpush1.bf16.msra.mxu0 %v860_v42  ;;  %v1205_v42 = vld [vmem:[%s1968_s8 + $0x18] sm:$0xff] }
 0x330   : > { %v857_v43 = vpop.permute.xlu0 %856 }
 0x331   : > { %v859_v44 = vpop.permute.xlu1 %858 }
 0x332   : > { %v861_v45 = vsel %vm553_vm6, %v857_v43, %v859_v44  ;;  %998 = vmatprep.subr.bf16.mxu0 %v859_v44 }
 0x333   : > { %999 = vmatpush1.bf16.msra.mxu0 %v861_v45 }
 0x334   : > { %v867_v46 = vpop.permute.xlu0 %866 }
 0x335   : > { %v869_v47 = vpop.permute.xlu1 %868 }
 0x336   : > { %v874_v48 = vsel %vm568_vm7, %v867_v46, %v869_v47  ;;  %1000 = vmatprep.subr.bf16.mxu0 %v869_v47 }
 0x337   : > { %1001 = vmatpush1.bf16.msra.mxu0 %v874_v48 }
 0x338   : > { %v871_v49 = vpop.permute.xlu0 %870 }
 0x339   : > { %v873_v50 = vpop.permute.xlu1 %872 }
 0x33a   : > { %v875_v51 = vsel %vm568_vm7, %v871_v49, %v873_v50  ;;  %1002 = vmatprep.subr.bf16.mxu0 %v873_v50 }
 0x33b   : > { %1003 = vmatpush1.bf16.msra.mxu0 %v875_v51 }
 0x33c   : > { %v881_v52 = vpop.permute.xlu0 %880 }
 0x33d   : > { %v883_v53 = vpop.permute.xlu1 %882 }
 0x33e   : > { %v888_v54 = vsel %vm583_vm8, %v881_v52, %v883_v53  ;;  %1004 = vmatprep.subr.bf16.mxu0 %v883_v53 }
 0x33f   : > { %1005 = vmatpush1.bf16.msra.mxu0 %v888_v54 }
 0x340   : > { %v885_v55 = vpop.permute.xlu0 %884 }
 0x341   : > { %v887_v56 = vpop.permute.xlu1 %886 }
 0x342   : > { %v889_v57 = vsel %vm583_vm8, %v885_v55, %v887_v56  ;;  %1006 = vmatprep.subr.bf16.mxu0 %v887_v56 }
 0x343   : > { %1007 = vmatpush1.bf16.msra.mxu0 %v889_v57 }
 0x344   : > { %v895_v60 = vpop.permute.xlu0 %894 }
 0x345   : > { %v897_v61 = vpop.permute.xlu1 %896 }
 0x346   : > { %v902_v62 = vsel %vm598_vm9, %v895_v60, %v897_v61  ;;  %1009 = vmatmul.mubr.bf16.vlgmr.msra.gmra.mrb[8].mxu0 %v1579_v58  ;;  %1029 = vmatprep.subr.bf16.mxu0 %v897_v61 }
 0x347   : > { %1030 = vmatpush1.bf16.msra.mxu0 %v902_v62  ;;  %1018 = vmatprep.mubr.bf16.mxu0 %v1582_v59 }
 0x348   : > { %v899_v63 = vpop.permute.xlu0 %898 }
 0x349   : > { %v901_v1 = vpop.permute.xlu1 %900 }
 0x34a   : > { %v903_v2 = vsel %vm598_vm9, %v899_v63, %v901_v1  ;;  %1031 = vmatprep.subr.bf16.mxu0 %v901_v1 }
 0x34b   : > { %1032 = vmatpush1.bf16.msra.mxu0 %v903_v2 }
 0x34e   : > { %1019 = vmatmul.mubr.bf16.gmra.mrb[12].mxu0 %v1584_v3 }
 0x34f   : > { %1061 = vmatprep.mubr.bf16.mxu0 %v1603_v0 }
 0x356   : > { %1456 = vmatmul.mubr.msk.bf16.vlgmr.msra.gmra.mrb[8].mxu0 %vm667_vm10, %v1585_v4 }
 0x357   : > { %1071 = vmatprep.mubr.bf16.mxu0 %v1603_v0 }
 0x359   : > { %v923_v6 = vpop.permute.xlu0 %922 }
 0x35a   : > { %v928_v10 = vpop.permute.xlu1 %927 }
 0x35d   : > { %v933_v20 = vpop.permute.xlu0 %932 }
 0x35e   : > { %1457 = vmatmul.mubr.msk.bf16.gmra.mrb[12].mxu0 %vm667_vm10, %v1586_v5  ;;  %v938_v25 = vpop.permute.xlu1 %937 }
 0x35f   : > { %1505 = vmatprep.mubr.msk.bf16.mxu0 %vm667_vm10, %v1593_v38 }
 0x429   : > { %v1063_v7 = vpop.f32.mrb[8].mxu0 }
 0x42a   : > { %v1517_v8 = vadd.f32 %v1063_v7, %v923_v6  ;;  %v1065_v9 = vpop.f32.mrb[9].mxu0 }
 0x42b   : > { %v1518_v11 = vadd.f32 %v1065_v9, %v923_v6  ;;  %v1067_v12 = vpop.f32.mrb[10].mxu0 }
 0x42c   : > { %v1519_v13 = vadd.f32 %v1067_v12, %v928_v10  ;;  %v1069_v14 = vpop.f32.mrb[11].mxu0  ;;  %v1082_v16 = vmax.f32 %v1517_v8, 0.0 }
 0x42d   : > { %v1520_v15 = vadd.f32 %v1069_v14, %v928_v10  ;;  %v1083_v18 = vmax.f32 %v1518_v11, 0.0 }
 0x42e   : > { %v1084_v17 = vmax.f32 %v1519_v13, 0.0 }
 0x42f   : > { %v1085_v0 = vmax.f32 %v1520_v15, 0.0 }
 0x430   : > { %v1862_v19 = vpack.c.bf16 %v1084_v17, %v1082_v16 }
 0x431   : > { %v1091_v21 = vpack.c.bf16 %v1085_v0, %v1083_v18  ;;  %v1073_v22 = vpop.f32.mrb[12].mxu0 }
 0x432   : > { %v1521_v23 = vadd.f32 %v1073_v22, %v933_v20  ;;  %v1075_v24 = vpop.f32.mrb[13].mxu0  ;;  %1134 = vrot.lane.b32.xlu0 %v1862_v19, %s1607_s11  ;;  %v1590_v22 = vld [vmem:[%s1967_s7 + $0x1c] ss:$12 sps:$4 sm:$0xff]  }
 0x433   : > { %v1522_v26 = vadd.f32 %v1075_v24, %v933_v20  ;;  %v1077_v27 = vpop.f32.mrb[14].mxu0  ;;  %1136 = vrot.lane.b32.xlu1 %v1091_v21, %s1607_s11 }
 0x434   : > { %v1523_v28 = vadd.f32 %v1077_v27, %v938_v25  ;;  %v1079_v29 = vpop.f32.mrb[15].mxu0  ;;  %v1086_v31 = vmax.f32 %v1521_v23, 0.0 }
 0x435   : > { %v1524_v30 = vadd.f32 %v1079_v29, %v938_v25  ;;  %v1087_v33 = vmax.f32 %v1522_v26, 0.0  ;;  %v1592_v29 = vld [vmem:[%s1967_s7 + $0x18] ss:$12 sps:$4 sm:$0xff]  }
 0x436   : > { %v1088_v32 = vmax.f32 %v1523_v28, 0.0  ;;  %1146 = vrot.lane.b32.xlu0 %v1862_v19, %s1608_s12 }
 0x437   : > { %v1089_v34 = vmax.f32 %v1524_v30, 0.0  ;;  %1148 = vrot.lane.b32.xlu1 %v1091_v21, %s1608_s12  ;;  %v1594_v30 = vld [vmem:[%s1967_s7 + $0x20] ss:$12 sps:$4 sm:$0xff]  }
 0x438   : > { %v1092_v35 = vpack.c.bf16 %v1088_v32, %v1086_v31 }
 0x439   : > { %v1093_v36 = vpack.c.bf16 %v1089_v34, %v1087_v33 }
 0x43a   : > { %1098 = vrot.lane.b32.xlu0 %v1862_v19, %s1604_s27 }
 0x43b   : > { %1100 = vrot.lane.b32.xlu1 %v1091_v21, %s1604_s27 }
 0x43e   : > { %1158 = vrot.lane.b32.xlu0 %v1862_v19, %s1609_s13 }
 0x43f   : > { %1160 = vrot.lane.b32.xlu1 %v1091_v21, %s1609_s13 }
 0x442   : > { %1110 = vrot.lane.b32.xlu0 %v1862_v19, %s1605_s28 }
 0x443   : > { %1112 = vrot.lane.b32.xlu1 %v1091_v21, %s1605_s28 }
 0x446   : > { %1170 = vrot.lane.b32.xlu0 %v1862_v19, %s1610_s16 }
 0x447   : > { %1172 = vrot.lane.b32.xlu1 %v1091_v21, %s1610_s16 }
 0x44a   : > { %1138 = vrot.lane.b32.xlu0 %v1092_v35, %s1607_s11 }
 0x44b   : > { %1140 = vrot.lane.b32.xlu1 %v1093_v36, %s1607_s11 }
 0x44e   : > { %1122 = vrot.lane.b32.xlu0 %v1862_v19, %s1606_s29 }
 0x44f   : > { %1124 = vrot.lane.b32.xlu1 %v1091_v21, %s1606_s29 }
 0x452   : > { %1150 = vrot.lane.b32.xlu0 %v1092_v35, %s1608_s12 }
 0x453   : > { %1152 = vrot.lane.b32.xlu1 %v1093_v36, %s1608_s12 }
 0x456   : > { %1102 = vrot.lane.b32.xlu0 %v1092_v35, %s1604_s27 }
 0x457   : > { %1104 = vrot.lane.b32.xlu1 %v1093_v36, %s1604_s27  ;;  %s332_s27 = scalar_lea.vmem %s1969_s9, %s1468_s24 }
 0x45a   : > { %1162 = vrot.lane.b32.xlu0 %v1092_v35, %s1609_s13 }
 0x45b   : > { %1164 = vrot.lane.b32.xlu1 %v1093_v36, %s1609_s13 }
 0x45e   : > { %1114 = vrot.lane.b32.xlu0 %v1092_v35, %s1605_s28 }
 0x45f   : > { %1116 = vrot.lane.b32.xlu1 %v1093_v36, %s1605_s28 }
 0x462   : > { %1174 = vrot.lane.b32.xlu0 %v1092_v35, %s1610_s16 }
 0x463   : > { %1176 = vrot.lane.b32.xlu1 %v1093_v36, %s1610_s16 }
 0x466   : > { %1126 = vrot.lane.b32.xlu0 %v1092_v35, %s1606_s29 }
 0x467   : > { %1128 = vrot.lane.b32.xlu1 %v1093_v36, %s1606_s29 }
 0x46a   : > { %1182 = vrot.lane.b32.xlu0 %v1862_v19, %s1611_s17 }
 0x46b   : > { %1184 = vrot.lane.b32.xlu1 %v1091_v21, %s1611_s17  ;;  %v1587_v21 = vld [vmem:[%s1967_s7] ss:$12 sps:$4 sm:$0xff]  }
 0x46e   : > { %1186 = vrot.lane.b32.xlu0 %v1092_v35, %s1611_s17 }
 0x46f   : > { %1188 = vrot.lane.b32.xlu1 %v1093_v36, %s1611_s17 }
 0x472   : > { %1208 = vperm.xlu0 %1559, %v1202_v39  }
 0x473   : > { %1213 = vperm.xlu1 %1560, %v1203_v40  }
 0x476   : > { %1218 = vperm.xlu0 %1559, %v1204_v41  }
 0x477   : > { %1223 = vperm.xlu1 %1560, %v1205_v42  }
 0x4a4   : > { %v1135_v43 = vpop.permute.xlu0 %1134 }
 0x4a5   : > { %v1137_v44 = vpop.permute.xlu1 %1136 }
 0x4a6   : > { %v1142_v45 = vsel %vm538_vm5, %v1135_v43, %v1137_v44 }
 0x4a7   : > { %1469 = vmatprep.subr.bf16.mxu1 %v1142_v45 }
 0x4a8   : > { %1470 = vmatpush3.bf16.msra.mxu1 %v1862_v19  ;;  %v1147_v46 = vpop.permute.xlu0 %1146 }
 0x4a9   : > { %v1149_v47 = vpop.permute.xlu1 %1148 }
 0x4aa   : > { %v1154_v60 = vsel %vm553_vm6, %v1147_v46, %v1149_v47 }
 0x4ac   : > { %v1099_v48 = vpop.permute.xlu0 %1098 }
 0x4ad   : > { %v1101_v49 = vpop.permute.xlu1 %1100 }
 0x4ae   : > { %v1106_v62 = vsel %vm493_vm2, %v1099_v48, %v1101_v49 }
 0x4b0   : > { %v1159_v50 = vpop.permute.xlu0 %1158 }
 0x4b1   : > { %v1161_v51 = vpop.permute.xlu1 %1160 }
 0x4b2   : > { %v1166_v6 = vsel %vm568_vm7, %v1159_v50, %v1161_v51 }
 0x4b4   : > { %v1111_v52 = vpop.permute.xlu0 %1110 }
 0x4b5   : > { %v1113_v53 = vpop.permute.xlu1 %1112 }
 0x4b6   : > { %v1118_v9 = vsel %vm508_vm3, %v1111_v52, %v1113_v53 }
 0x4b8   : > { %v1171_v54 = vpop.permute.xlu0 %1170 }
 0x4b9   : > { %v1173_v55 = vpop.permute.xlu1 %1172 }
 0x4ba   : > { %v1178_v14 = vsel %vm583_vm8, %v1171_v54, %v1173_v55 }
 0x4bc   : > { %v1139_v56 = vpop.permute.xlu0 %1138 }
 0x4bd   : > { %v1141_v57 = vpop.permute.xlu1 %1140 }
 0x4be   : > { %v1143_v58 = vsel %vm538_vm5, %v1139_v56, %v1141_v57 }
 0x4bf   : > { %1471 = vmatprep.subr.bf16.mxu1 %v1143_v58 }
 0x4c0   : > { %1472 = vmatpush3.bf16.msra.mxu1 %v1092_v35  ;;  %v1123_v59 = vpop.permute.xlu0 %1122 }
 0x4c1   : > { %v1125_v61 = vpop.permute.xlu1 %1124  ;;  %1473 = vmatprep.subr.bf16.mxu1 %v1154_v60 }
 0x4c2   : > { %v1130_v17 = vsel %vm523_vm4, %v1123_v59, %v1125_v61 }
 0x4c4   : > { %1474 = vmatpush3.bf16.msra.mxu1 %v1106_v62  ;;  %v1151_v63 = vpop.permute.xlu0 %1150 }
 0x4c5   : > { %v1153_v1 = vpop.permute.xlu1 %1152 }
 0x4c6   : > { %v1155_v2 = vsel %vm553_vm6, %v1151_v63, %v1153_v1 }
 0x4c7   : > { %1475 = vmatprep.subr.bf16.mxu1 %v1155_v2 }
 0x4c8   : > { %v1103_v3 = vpop.permute.xlu0 %1102 }
 0x4c9   : > { %v1105_v4 = vpop.permute.xlu1 %1104 }
 0x4ca   : > { %v1107_v5 = vsel %vm493_vm2, %v1103_v3, %v1105_v4 }
 0x4cb   : > { %1476 = vmatpush3.bf16.msra.mxu1 %v1107_v5 }
 0x4cc   : > { %1477 = vmatprep.subr.bf16.mxu1 %v1166_v6  ;;  %v1163_v7 = vpop.permute.xlu0 %1162 }
 0x4cd   : > { %v1165_v8 = vpop.permute.xlu1 %1164 }
 0x4ce   : > { %v1167_v10 = vsel %vm568_vm7, %v1163_v7, %v1165_v8 }
 0x4cf   : > { %1478 = vmatpush3.bf16.msra.mxu1 %v1118_v9 }
 0x4d0   : > { %1479 = vmatprep.subr.bf16.mxu1 %v1167_v10  ;;  %v1115_v11 = vpop.permute.xlu0 %1114 }
 0x4d1   : > { %v1117_v12 = vpop.permute.xlu1 %1116 }
 0x4d2   : > { %v1119_v13 = vsel %vm508_vm3, %v1115_v11, %v1117_v12 }
 0x4d3   : > { %1480 = vmatpush3.bf16.msra.mxu1 %v1119_v13 }
 0x4d4   : > { %1481 = vmatprep.subr.bf16.mxu1 %v1178_v14  ;;  %v1175_v15 = vpop.permute.xlu0 %1174 }
 0x4d5   : > { %v1177_v16 = vpop.permute.xlu1 %1176 }
 0x4d6   : > { %v1179_v18 = vsel %vm583_vm8, %v1175_v15, %v1177_v16 }
 0x4d7   : > { %1482 = vmatpush3.bf16.msra.mxu1 %v1130_v17 }
 0x4d8   : > { %1483 = vmatprep.subr.bf16.mxu1 %v1179_v18  ;;  %v1127_v0 = vpop.permute.xlu0 %1126 }
 0x4d9   : > { %v1129_v19 = vpop.permute.xlu1 %1128 }
 0x4da   : > { %v1131_v20 = vsel %vm523_vm4, %v1127_v0, %v1129_v19 }
 0x4db   : > { %1484 = vmatpush3.bf16.msra.mxu1 %v1131_v20 }
 0x4dc   : > { %v1183_v23 = vpop.permute.xlu0 %1182 }
 0x4dd   : > { %v1185_v24 = vpop.permute.xlu1 %1184 }
 0x4de   : > { %1295 = vmatmul.mubr.bf16.vlgmr.msra.gmra.mrb[8].mxu1 %v1587_v21  ;;  %v1190_v25 = vsel %vm598_vm9, %v1183_v23, %v1185_v24 }
 0x4df   : > { %1501 = vmatprep.subr.bf16.mxu0 %v1190_v25  ;;  %1302 = vmatprep.mubr.bf16.mxu1 %v1590_v22 }
 0x4e0   : > { %1502 = vmatpush3.bf16.msra.mxu0 %v1190_v25  ;;  %v1187_v26 = vpop.permute.xlu0 %1186 }
 0x4e1   : > { %v1189_v27 = vpop.permute.xlu1 %1188 }
 0x4e2   : > { %v1191_v28 = vsel %vm598_vm9, %v1187_v26, %v1189_v27 }
 0x4e3   : > { %1503 = vmatprep.subr.bf16.mxu0 %v1191_v28 }
 0x4e4   : > { %1504 = vmatpush3.bf16.msra.mxu0 %v1191_v28 }
 0x4e6   : > { %1303 = vmatmul.mubr.bf16.gmra.mrb[12].mxu1 %v1592_v29 }
 0x4e7   : > { %1506 = vmatmul.mubr.msk.bf16.vlgmr.msra.gmra.mrb[16].mxu0 %vm667_vm10, %v1594_v30 }
 0x4f1   : > { %v1209_v33 = vpop.permute.xlu0 %1208 }
 0x4f2   : > { %v1214_v38 = vpop.permute.xlu1 %1213 }
 0x4f5   : > { %v1219_v39 = vpop.permute.xlu0 %1218 }
 0x4f6   : > { %v1224_v54 = vpop.permute.xlu1 %1223 }
 0x5b1   : > { %v1485_v31 = vpop.f32.mrb[8].mxu1 }
 0x5b2   : > { %v1486_v32 = vpop.f32.mrb[9].mxu1 }
 0x5b3   : > { %v1487_v34 = vadd.f32 %v1486_v32, %v1485_v31  ;;  %v1488_v35 = vpop.f32.mrb[10].mxu1 }
 0x5b4   : > { %v1489_v36 = vpop.f32.mrb[11].mxu1 }
 0x5b5   : > { %v1490_v37 = vadd.f32 %v1489_v36, %v1488_v35  ;;  %v1297_v43 = vadd.f32 %v1487_v34, %v1209_v33 }
 0x5b7   : > { %v1300_v50 = vadd.f32 %v1490_v37, %v1214_v38 }
 0x5b9   : > { %v1491_v40 = vpop.f32.mrb[12].mxu1 }
 0x5ba   : > { %v1492_v41 = vpop.f32.mrb[13].mxu1  ;;  %v1507_v42 = vpop.f32.mrb[16].mxu0 }
 0x5bb   : > { %v1493_v44 = vadd.f32 %v1492_v41, %v1491_v40  ;;  %v1494_v45 = vpop.f32.mrb[14].mxu1  ;;  %v1345_v46 = vpop.f32.mrb[17].mxu0 }
 0x5bc   : > { %v1346_v47 = vadd.f32 %v1345_v46, %v1297_v43  ;;  %v1495_v48 = vpop.f32.mrb[15].mxu1  ;;  %v1508_v49 = vpop.f32.mrb[18].mxu0 }
 0x5bd   : > { %v1305_v51 = vadd.f32 %v1493_v44, %v1219_v39  ;;  %v1496_v52 = vadd.f32 %v1495_v48, %v1494_v45  ;;  %v1348_v53 = vpop.f32.mrb[19].mxu0 }
 0x5be   : > { %v1360_v55 = vmax.f32 %v1346_v47, 0.0  ;;  %v1349_v56 = vadd.f32 %v1348_v53, %v1300_v50 }
 0x5bf   : > { %v1354_v57 = vadd.f32 %v1507_v42, %v1305_v51  ;;  %v1308_v58 = vadd.f32 %v1496_v52, %v1224_v54 }
 0x5c0   : > { %1364 = vst [vmem:[%s332_s27] sm:$0xff] %v1360_v55  ;;  %v1361_v59 = vmax.f32 %v1349_v56, 0.0 }
 0x5c1   : > { %v1362_v60 = vmax.f32 %v1354_v57, 0.0  ;;  %v1357_v61 = vadd.f32 %v1508_v49, %v1308_v58 }
 0x5c2   : > { %1365 = vst [vmem:[%s332_s27 + $0x8] sm:$0xff] %v1361_v59 }
 0x5c3   : > { %1366 = vst [vmem:[%s332_s27 + $0x10] sm:$0xff] %v1362_v60  ;;  %v1363_v62 = vmax.f32 %v1357_v61, 0.0 }
 0x5c5   : > { %1367 = vst [vmem:[%s332_s27 + $0x18] sm:$0xff] %v1363_v62 }
 0x5c6 PF: > { %s19_s30 = sadd.s32 1, %s1601_s30  }
 0x5c7   : > { %p16_p4 = scmp.ge.s32.totalorder %s19_s30, 4  }
 0x5c9   :  { %18 = sbr.rel (!%p16_p4) target bundleno = 1 (0x1), region = 86 }

</bundles_post_ra>
